<compile_context>
chip_gen: v7x
topology: tpu7x:2x2x1
jax: 0.10.0
libtpu: 0.0.40
codegen_flags: <defaults>
</compile_context>

<pallas_src>
import jax
import jax.numpy as jnp
from jax.experimental import pallas as pl
from jax.experimental.pallas import tpu as pltpu


_LANE = 128      # last block dim must be a multiple of this for lane-dense I/O
_SUBLANE = 8     # f32 sublane tile


def _round_up(x, m):
    return ((x + m - 1) // m) * m


def _aligner_kernel(x_ref, w1_ref, b1_ref, w2_ref, b2_ref, o_ref):
    # First linear + tanh (f32 MXU accumulation, f32 epilogue).
    h = jnp.dot(x_ref[...], w1_ref[...], preferred_element_type=jnp.float32)
    h = jnp.tanh(h + b1_ref[...].astype(jnp.float32))
    # Second linear + clamp.  Intentional cast: MXU operands in weight dtype
    # (f32 here; bf16 if bf16 weights are supplied on v6e/v7x).
    y = jnp.dot(h.astype(w2_ref.dtype), w2_ref[...],
                preferred_element_type=jnp.float32)
    y = y + b2_ref[...].astype(jnp.float32)
    o_ref[...] = jnp.clip(y, -0.3, 0.3).astype(o_ref.dtype)


def linear_aligner2(x, w1, b1, w2, b2, *, block_m=128):
    """Pallas forward for LinearAligner2.

    Args (PyTorch nn.Linear layout):
      x : [B, D_in]
      w1: [D_hid, D_in],  b1: [D_hid]
      w2: [D_out, D_hid], b2: [D_out]   (D_hid == D_out in the module)
    Returns [B, D_out].  block_m: batch tile (128 for v5e/v6e, 256 for v7x).
    """
    B, D_in = x.shape
    D_hid = w1.shape[0]
    D_out = w2.shape[0]

    # ---- lane-dense feature padding -------------------------------------
    d_in_p = _round_up(D_in, _LANE)
    d_hid_p = _round_up(D_hid, _LANE)
    d_out_p = _round_up(D_out, _LANE)

    # ---- batch tiling ----------------------------------------------------
    bm = min(block_m, _round_up(B, _SUBLANE))
    b_p = _round_up(B, bm)

    def pad2(a, rows, cols):
        return jnp.pad(a, ((0, rows - a.shape[0]), (0, cols - a.shape[1])))

    x_p = pad2(x, b_p, d_in_p)                        # [B_p,    D_in_p ]
    w1_p = pad2(w1.T, d_in_p, d_hid_p)                # [D_in_p, D_hid_p]
    w2_p = pad2(w2.T, d_hid_p, d_out_p)               # [D_hid_p,D_out_p]
    b1_p = pad2(b1.reshape(1, -1), 1, d_hid_p)        # [1,      D_hid_p]
    b2_p = pad2(b2.reshape(1, -1), 1, d_out_p)        # [1,      D_out_p]

    grid = (b_p // bm,)

    itemsize = x_p.dtype.itemsize
    flops = 2 * b_p * d_in_p * d_hid_p + 2 * b_p * d_hid_p * d_out_p
    bytes_accessed = itemsize * (
        b_p * d_in_p + d_in_p * d_hid_p + d_hid_p * d_out_p
        + d_hid_p + d_out_p + b_p * d_out_p)

    # Note: no vmem_limit_bytes needed at these sizes; add explicit K/N weight
    # tiling + vmem_limit_bytes before scaling D_out into the multi-K range
    # (v7x has only 64 MiB VMEM).
    out_p = pl.pallas_call(
        _aligner_kernel,
        out_shape=jax.ShapeDtypeStruct((b_p, d_out_p), x.dtype),
        grid=grid,
        in_specs=[
            # x: one batch tile per grid step.
            pl.BlockSpec((bm, d_in_p), lambda i: (i, 0)),
            # Weights / biases: block (0, 0) every step -> fetched once,
            # VMEM-resident for the whole batch loop.
            pl.BlockSpec((d_in_p, d_hid_p), lambda i: (0, 0)),
            pl.BlockSpec((1, d_hid_p), lambda i: (0, 0)),
            pl.BlockSpec((d_hid_p, d_out_p), lambda i: (0, 0)),
            pl.BlockSpec((1, d_out_p), lambda i: (0, 0)),
        ],
        out_specs=pl.BlockSpec((bm, d_out_p), lambda i: (i, 0)),
        compiler_params=pltpu.CompilerParams(
            dimension_semantics=("parallel",)),
        cost_estimate=pl.CostEstimate(
            flops=flops,
            transcendentals=b_p * d_hid_p,
            bytes_accessed=bytes_accessed),
    )(x_p, w1_p, b1_p, w2_p, b2_p)

    return out_p[:B, :D_out]


def reference(x, w1, b1, w2, b2):
    h = jnp.tanh(x @ w1.T + b1)
    return jnp.clip(h @ w2.T + b2, -0.3, 0.3)


if __name__ == "__main__":
    # Case 1: shapes from the module (clip_embed_dim=32, clap_embed_dim=32).
    B, CLIP_DIM, CLAP_DIM = 8, 32, 32
    key = jax.random.PRNGKey(0)
    kx, kw1, kb1, kw2, kb2 = jax.random.split(key, 5)

    x = jax.random.normal(kx, (B, CLIP_DIM), dtype=jnp.float32)
    w1 = jax.random.normal(kw1, (CLAP_DIM, CLIP_DIM), dtype=jnp.float32) * 0.1
    b1 = jax.random.normal(kb1, (CLAP_DIM,), dtype=jnp.float32) * 0.1
    w2 = jax.random.normal(kw2, (CLAP_DIM, CLAP_DIM), dtype=jnp.float32) * 0.1
    b2 = jax.random.normal(kb2, (CLAP_DIM,), dtype=jnp.float32) * 0.1

    out = jax.block_until_ready(linear_aligner2(x, w1, b1, w2, b2))
    ref = reference(x, w1, b1, w2, b2)
    assert out.shape == (B, CLAP_DIM)
    assert jnp.allclose(out, ref, atol=1e-5, rtol=1e-5), "case 1 mismatch"

    # Case 2: ragged dims + a multi-step batch grid (exercises padding/tiling).
    B2, D_IN2, D_OUT2 = 200, 48, 40
    ks = jax.random.split(jax.random.PRNGKey(1), 5)
    x2 = jax.random.normal(ks[0], (B2, D_IN2), dtype=jnp.float32)
    w1b = jax.random.normal(ks[1], (D_OUT2, D_IN2), dtype=jnp.float32) * 0.1
    b1b = jax.random.normal(ks[2], (D_OUT2,), dtype=jnp.float32) * 0.1
    w2b = jax.random.normal(ks[3], (D_OUT2, D_OUT2), dtype=jnp.float32) * 0.1
    b2b = jax.random.normal(ks[4], (D_OUT2,), dtype=jnp.float32) * 0.1

    out2 = jax.block_until_ready(linear_aligner2(x2, w1b, b1b, w2b, b2b))
    ref2 = reference(x2, w1b, b1b, w2b, b2b)
    assert out2.shape == (B2, D_OUT2)
    assert jnp.allclose(out2, ref2, atol=1e-5, rtol=1e-5), "case 2 mismatch"

    print("KERNEL_OK")
</pallas_src>

<mosaic_0001>
module attributes {stable_mosaic.version = 11 : i64} {
  func.func @_aligner_kernel(%arg0: i32, %arg1: memref<8x128xf32, #tpu.memory_space<vmem>>, %arg2: memref<128x128xf32, #tpu.memory_space<vmem>>, %arg3: memref<1x128xf32, #tpu.memory_space<vmem>>, %arg4: memref<128x128xf32, #tpu.memory_space<vmem>>, %arg5: memref<1x128xf32, #tpu.memory_space<vmem>>, %arg6: memref<8x128xf32, #tpu.memory_space<vmem>>) attributes {dimension_semantics = [#tpu.dimension_semantics<parallel>], iteration_bounds = array<i64: 1>, scalar_prefetch = 0 : i64, scratch_operands = 0 : i64, tpu.core_type = #tpu.core_type<tc>, window_params = [{transform_indices = @transform_0, window_bounds = array<i64: 8, 128>}, {pipeline_mode = #tpu.pipeline_mode<synchronous>, transform_indices = @transform_1, window_bounds = array<i64: 128, 128>}, {pipeline_mode = #tpu.pipeline_mode<synchronous>, transform_indices = @transform_2, window_bounds = array<i64: 1, 128>}, {pipeline_mode = #tpu.pipeline_mode<synchronous>, transform_indices = @transform_3, window_bounds = array<i64: 128, 128>}, {pipeline_mode = #tpu.pipeline_mode<synchronous>, transform_indices = @transform_4, window_bounds = array<i64: 1, 128>}, {transform_indices = @transform_5, window_bounds = array<i64: 8, 128>}]} {
    %c0 = arith.constant 0 : index
    %c0_0 = arith.constant 0 : index
    %0 = vector.load %arg1[%c0, %c0_0] : memref<8x128xf32, #tpu.memory_space<vmem>>, vector<8x128xf32>
    %c0_1 = arith.constant 0 : index
    %c0_2 = arith.constant 0 : index
    %1 = vector.load %arg2[%c0_1, %c0_2] : memref<128x128xf32, #tpu.memory_space<vmem>>, vector<128x128xf32>
    %cst = arith.constant dense<0.000000e+00> : vector<8x128xf32>
    %2 = tpu.matmul %0, %1, %cst {dimension_numbers = #tpu.dot_dimension_numbers<[1], [0], [0], [1], [0, 0, 1, 1], [], []>} : vector<8x128xf32>, vector<128x128xf32>, vector<8x128xf32> -> vector<8x128xf32>
    %c0_3 = arith.constant 0 : index
    %c0_4 = arith.constant 0 : index
    %3 = vector.load %arg3[%c0_3, %c0_4] : memref<1x128xf32, #tpu.memory_space<vmem>>, vector<1x128xf32>
    %4 = vector.broadcast %3 : vector<1x128xf32> to vector<8x128xf32>
    %5 = arith.addf %2, %4 : vector<8x128xf32>
    %6 = math.tanh %5 : vector<8x128xf32>
    %c0_5 = arith.constant 0 : index
    %c0_6 = arith.constant 0 : index
    %7 = vector.load %arg4[%c0_5, %c0_6] : memref<128x128xf32, #tpu.memory_space<vmem>>, vector<128x128xf32>
    %cst_7 = arith.constant dense<0.000000e+00> : vector<8x128xf32>
    %8 = tpu.matmul %6, %7, %cst_7 {dimension_numbers = #tpu.dot_dimension_numbers<[1], [0], [0], [1], [0, 0, 1, 1], [], []>} : vector<8x128xf32>, vector<128x128xf32>, vector<8x128xf32> -> vector<8x128xf32>
    %c0_8 = arith.constant 0 : index
    %c0_9 = arith.constant 0 : index
    %9 = vector.load %arg5[%c0_8, %c0_9] : memref<1x128xf32, #tpu.memory_space<vmem>>, vector<1x128xf32>
    %10 = vector.broadcast %9 : vector<1x128xf32> to vector<8x128xf32>
    %11 = arith.addf %8, %10 : vector<8x128xf32>
    %cst_10 = arith.constant -3.000000e-01 : f32
    %cst_11 = arith.constant 3.000000e-01 : f32
    %12 = vector.broadcast %cst_10 : f32 to vector<8x128xf32>
    %13 = arith.maximumf %12, %11 : vector<8x128xf32>
    %14 = vector.broadcast %cst_11 : f32 to vector<8x128xf32>
    %15 = arith.minimumf %14, %13 : vector<8x128xf32>
    %c0_12 = arith.constant 0 : index
    %c0_13 = arith.constant 0 : index
    %16 = vector.load %arg6[%c0_12, %c0_13] : memref<8x128xf32, #tpu.memory_space<vmem>>, vector<8x128xf32>
    tpu.vector_store %arg6[%c0_12, %c0_13], %15 {strides = array<i32>} : memref<8x128xf32, #tpu.memory_space<vmem>>, vector<8x128xf32>,
    return
  }
  func.func @transform_0(%arg0: i32) -> (i32, i32) {
    %c0_i32 = arith.constant 0 : i32
    %c0_i32_0 = arith.constant 0 : i32
    return %arg0, %c0_i32 : i32, i32
  }
  func.func @transform_1(%arg0: i32) -> (i32, i32) {
    %c0_i32 = arith.constant 0 : i32
    %c0_i32_0 = arith.constant 0 : i32
    %c0_i32_1 = arith.constant 0 : i32
    return %c0_i32, %c0_i32_0 : i32, i32
  }
  func.func @transform_2(%arg0: i32) -> (i32, i32) {
    %c0_i32 = arith.constant 0 : i32
    %c0_i32_0 = arith.constant 0 : i32
    %c0_i32_1 = arith.constant 0 : i32
    return %c0_i32, %c0_i32_0 : i32, i32
  }
  func.func @transform_3(%arg0: i32) -> (i32, i32) {
    %c0_i32 = arith.constant 0 : i32
    %c0_i32_0 = arith.constant 0 : i32
    %c0_i32_1 = arith.constant 0 : i32
    return %c0_i32, %c0_i32_0 : i32, i32
  }
  func.func @transform_4(%arg0: i32) -> (i32, i32) {
    %c0_i32 = arith.constant 0 : i32
    %c0_i32_0 = arith.constant 0 : i32
    %c0_i32_1 = arith.constant 0 : i32
    return %c0_i32, %c0_i32_0 : i32, i32
  }
  func.func @transform_5(%arg0: i32) -> (i32, i32) {
    %c0_i32 = arith.constant 0 : i32
    %c0_i32_0 = arith.constant 0 : i32
    return %arg0, %c0_i32 : i32, i32
  }
}

</mosaic_0001>

<bundles_post_ra>
// kernel: tpu_custom_call.1
= control target key start
LH: loop header
LB: loop body
LE: loop exit
PB: predicated region body
PF: predicated region fallthrough
CT: control target
= control target key end

     0   :  { %10 = vsyncpa [#allocation3], 0  ;;  %s642_s0 = inlined_call_operand.hbm [shape: f32[8,128], index: 0, kind: input, shape index: {}]   ;;  %s643_s1 = inlined_call_operand.hbm [shape: f32[128,128], index: 1, kind: input, shape index: {}]   ;;  %s644_s2 = inlined_call_operand.vmem [shape: f32[1,128], index: 2, kind: input, shape index: {}]   ;;  %s645_s3 = inlined_call_operand.hbm [shape: f32[128,128], index: 3, kind: input, shape index: {}]   ;;  %s646_s4 = inlined_call_operand.vmem [shape: f32[1,128], index: 4, kind: input, shape index: {}]   ;;  %s647_s5 = inlined_call_operand.hbm [shape: f32[8,128], index: 5, kind: output, shape index: {}]  }
   0x1   :  { %11 = vsyncpa [#allocation6], 0 }
   0x2   :  { %12 = vsyncpa [#allocation4], 0  ;;  %s527_s18 = smov [#allocation5]   ;;  %s433_s22 = scalar_lea.hbm %s643_s1, 2048 }
   0x3   :  { %s28_s19 = sshll.u32 %s527_s18, 4  ;;  %p434_p0 = scmp.ne.s32.totalorder %s643_s1, %s433_s22  ;;  %s29_s19 = int_to_ptr.vmem [resolvable:$true] %s28_s19 }
   0x4   :  { %p437_p1 = scmp.lt.u32.totalorder %s433_s22, %s643_s1 }
   0x6   :  { %p439_p2 = pnand %p437_p1, %p434_p0 }
   0x8   :  { %442 = shalt.err (!%p439_p2)
}
   0x9   :  { %s443_s27 = scalar_lea.vmem %s29_s19, 2048  ;;  %p448_p4 = scmp.lt.s32.totalorder %s29_s19, %s29_s19 }
   0xa   :  { %p444_p3 = scmp.ne.s32.totalorder %s29_s19, %s443_s27  ;;  %p449_p5 = scmp.lt.s32.totalorder %s443_s27, %s443_s27 }
   0xc   :  { %p450_p6 = por %p449_p5, %p448_p4 }
   0xe   :  { %p451_p7 = pnand %p450_p6, %p444_p3 }
  0x10   :  { %454 = shalt.err (!%p451_p7)
}
  0x11   :  { %s528_s28 = smov 128   ;;  %s529_s29 = smov 8  }
  0x12   :  { %34 = dma.hbm_to_vmem [thread:$0]  %s643_s1, 2048, %s29_s19, [#allocation6], %s528_s28, %s528_s28, %s529_s29  }
  0x13   :  { %s530_s7 = smov [#allocation2]   ;;  %s531_s9 = smov [#allocation7]  }
  0x14   :  { %s19_s8 = sshll.u32 %s530_s7, 4  ;;  %s42_s10 = sshll.u32 %s531_s9, 4  ;;  %s20_s8 = int_to_ptr.vmem [resolvable:$true] %s19_s8  ;;  %s43_s10 = int_to_ptr.vmem [resolvable:$true] %s42_s10 }
  0x15   :  { %s455_s13 = scalar_lea.hbm %s642_s0, 128 }
  0x16   :  { %p456_p8 = scmp.ne.s32.totalorder %s642_s0, %s455_s13  ;;  %p459_p9 = scmp.lt.u32.totalorder %s455_s13, %s642_s0 }
  0x18   :  { %p461_p10 = pnand %p459_p9, %p456_p8 }
  0x1a   :  { %464 = shalt.err (!%p461_p10)
}
  0x1b   :  { %s465_s1 = scalar_lea.vmem %s20_s8, 128  ;;  %p470_p12 = scmp.lt.s32.totalorder %s20_s8, %s20_s8 }
  0x1c   :  { %p466_p11 = scmp.ne.s32.totalorder %s20_s8, %s465_s1  ;;  %p471_p13 = scmp.lt.s32.totalorder %s465_s1, %s465_s1 }
  0x1e   :  { %p472_p0 = por %p471_p13, %p470_p12 }
  0x20   :  { %p473_p1 = pnand %p472_p0, %p466_p11 }
  0x22   :  { %476 = shalt.err (!%p473_p1)
}
  0x23   :  { %22 = dma.hbm_to_vmem [thread:$0]  %s642_s0, 128, %s20_s8, [#allocation3]  }
  0x24   :  { %s477_s22 = scalar_lea.hbm %s645_s3, 2048 }
  0x25   :  { %p478_p2 = scmp.ne.s32.totalorder %s645_s3, %s477_s22  ;;  %p481_p3 = scmp.lt.u32.totalorder %s477_s22, %s645_s3 }
  0x27   :  { %p483_p4 = pnand %p481_p3, %p478_p2 }
  0x29   :  { %486 = shalt.err (!%p483_p4)
}
  0x2a   :  { %s487_s27 = scalar_lea.vmem %s43_s10, 2048  ;;  %p492_p6 = scmp.lt.s32.totalorder %s43_s10, %s43_s10 }
  0x2b   :  { %p488_p5 = scmp.ne.s32.totalorder %s43_s10, %s487_s27  ;;  %p493_p7 = scmp.lt.s32.totalorder %s487_s27, %s487_s27 }
  0x2d   :  { %p494_p8 = por %p493_p7, %p492_p6 }
  0x2f   :  { %p495_p9 = pnand %p494_p8, %p488_p5 }
  0x31   :  { %498 = shalt.err (!%p495_p9)
}
  0x32   :  { %48 = dma.hbm_to_vmem [thread:$0]  %s645_s3, 2048, %s43_s10, [#allocation6], %s528_s28, %s528_s28, %s529_s29  }
  0x33   :  { %521 = dma.done.wait [#allocation3], 128  }
  0x34   :  { %522 = vsyncadd [#allocation3], 4294967168 }
  0x35   :  { %523 = dma.done.wait [#allocation6], 4096  }
  0x36   :  { %524 = vsyncadd [#allocation6], 4294963200  ;;  %v532_v0 = vmov 0.0|0.0   ;;  %vm533_vm0 = vmmov 0   ;;  %v534_v1 = vmov 0.0   ;;  %v61_v2 = vld [vmem:[#allocation5] sm:$0xff] }
  0x37   :  { %374 = vmatprep.subr.bf16.mxu0 %v532_v0  ;;  %336 = vmatprep.mubr.msk.f32.mxu0 %vm533_vm0, %v534_v1  ;;  %v62_v3 = vld [vmem:[#allocation5 + $0x8] sm:$0xff]  ;;  %v63_v4 = vld [vmem:[#allocation5 + $0x10] sm:$0xff]  ;;  %v64_v6 = vld [vmem:[#allocation5 + $0x18] sm:$0xff]  ;;  %s535_s7 = smov [#allocation8]  }
  0x38   :  { %398 = vmatprep.subr.bf16.mxu1 %v532_v0  ;;  %371 = vmatprep.mubr.msk.f32.mxu1 %vm533_vm0, %v534_v1  ;;  %v375_v5 = vpack.c.bf16 %v62_v3, %v61_v2  ;;  %v378_v7 = vpack.c.bf16 %v64_v6, %v63_v4  ;;  %v65_v8 = vld [vmem:[#allocation5 + $0x20] sm:$0xff]  ;;  %v66_v9 = vld [vmem:[#allocation5 + $0x28] sm:$0xff]  ;;  %v157_v12 = vld [vmem:[#allocation7 + $0x10] sm:$0xff]  ;;  %s257_s8 = sshll.u32 %s535_s7, 4  ;;  %s258_s8 = int_to_ptr.vmem [resolvable:$true] %s257_s8 }
  0x39   :  { %v155_v10 = vld [vmem:[#allocation7] sm:$0xff]  ;;  %v156_v11 = vld [vmem:[#allocation7 + $0x8] sm:$0xff]  ;;  %v158_v13 = vld [vmem:[#allocation7 + $0x18] sm:$0xff]  ;;  %v381_v14 = vpack.c.bf16 %v66_v9, %v65_v8  ;;  %s499_s9 = scalar_lea.vmem %s258_s8, 128  ;;  %p504_p11 = scmp.lt.s32.totalorder %s258_s8, %s258_s8 }
  0x3a   :  { %376 = vmatpush3.bf16.msra.mxu0 %v375_v5  ;;  %v399_v15 = vpack.c.bf16 %v156_v11, %v155_v10  ;;  %v67_v16 = vld [vmem:[#allocation5 + $0x30] sm:$0xff]  ;;  %v68_v17 = vld [vmem:[#allocation5 + $0x38] sm:$0xff]  ;;  %v402_v18 = vpack.c.bf16 %v158_v13, %v157_v12  ;;  %v159_v19 = vld [vmem:[#allocation7 + $0x20] sm:$0xff]  ;;  %p500_p10 = scmp.ne.s32.totalorder %s258_s8, %s499_s9  ;;  %p505_p12 = scmp.lt.s32.totalorder %s499_s9, %s499_s9 }
  0x3b   :  { %377 = vmatprep.subr.bf16.mxu0 %v532_v0  ;;  %v160_v20 = vld [vmem:[#allocation7 + $0x28] sm:$0xff]  ;;  %v384_v21 = vpack.c.bf16 %v68_v17, %v67_v16  ;;  %v69_v22 = vld [vmem:[#allocation5 + $0x40] sm:$0xff]  ;;  %v161_v25 = vld [vmem:[#allocation7 + $0x30] sm:$0xff] }
  0x3c   :  { %400 = vmatpush3.bf16.msra.mxu1 %v399_v15  ;;  %v70_v23 = vld [vmem:[#allocation5 + $0x48] sm:$0xff]  ;;  %v405_v24 = vpack.c.bf16 %v160_v20, %v159_v19  ;;  %v162_v26 = vld [vmem:[#allocation7 + $0x38] sm:$0xff]  ;;  %v71_v28 = vld [vmem:[#allocation5 + $0x50] sm:$0xff]  ;;  %p506_p13 = por %p505_p12, %p504_p11 }
  0x3d   :  { %401 = vmatprep.subr.bf16.mxu1 %v532_v0  ;;  %v387_v27 = vpack.c.bf16 %v70_v23, %v69_v22  ;;  %v72_v29 = vld [vmem:[#allocation5 + $0x58] sm:$0xff]  ;;  %v408_v30 = vpack.c.bf16 %v162_v26, %v161_v25  ;;  %v163_v31 = vld [vmem:[#allocation7 + $0x40] sm:$0xff]  ;;  %v164_v32 = vld [vmem:[#allocation7 + $0x48] sm:$0xff] }
  0x3e   :  { %379 = vmatpush3.bf16.msra.mxu0 %v378_v7  ;;  %v390_v33 = vpack.c.bf16 %v72_v29, %v71_v28  ;;  %v73_v34 = vld [vmem:[#allocation5 + $0x60] sm:$0xff]  ;;  %v74_v35 = vld [vmem:[#allocation5 + $0x68] sm:$0xff]  ;;  %v411_v36 = vpack.c.bf16 %v164_v32, %v163_v31  ;;  %v75_v38 = vld [vmem:[#allocation5 + $0x70] sm:$0xff]  ;;  %p507_p0 = pnand %p506_p13, %p500_p10 }
  0x3f   :  { %380 = vmatprep.subr.bf16.mxu0 %v532_v0  ;;  %v393_v37 = vpack.c.bf16 %v74_v35, %v73_v34  ;;  %v76_v39 = vld [vmem:[#allocation5 + $0x78] sm:$0xff]  ;;  %v165_v42 = vld [vmem:[#allocation7 + $0x50] sm:$0xff]  ;;  %v167_v45 = vld [vmem:[#allocation7 + $0x60] sm:$0xff] }
  0x40   :  { %403 = vmatpush3.bf16.msra.mxu1 %v402_v18  ;;  %v396_v40 = vpack.c.bf16 %v76_v39, %v75_v38  ;;  %v60_v41 = vld [vmem:[#allocation2] sm:$0xff]  ;;  %v168_v46 = vld [vmem:[#allocation7 + $0x68] sm:$0xff]  ;;  %v169_v48 = vld [vmem:[#allocation7 + $0x70] sm:$0xff] }
  0x41   :  { %404 = vmatprep.subr.bf16.mxu1 %v532_v0  ;;  %v166_v43 = vld [vmem:[#allocation7 + $0x58] sm:$0xff]  ;;  %v417_v47 = vpack.c.bf16 %v168_v46, %v167_v45 }
  0x42   :  { %382 = vmatpush3.bf16.msra.mxu0 %v381_v14  ;;  %v414_v44 = vpack.c.bf16 %v166_v43, %v165_v42  ;;  %v170_v49 = vld [vmem:[#allocation7 + $0x78] sm:$0xff] }
  0x43   :  { %383 = vmatprep.subr.bf16.mxu0 %v532_v0  ;;  %v420_v50 = vpack.c.bf16 %v170_v49, %v169_v48  ;;  %v267_v51 = vld [vmem:[%s644_s2] ss:$0 sm:$0xff] }
  0x44   :  { %406 = vmatpush3.bf16.msra.mxu1 %v405_v24  ;;  %v268_v56 = vld [vmem:[%s646_s4] ss:$0 sm:$0xff] }
  0x45   :  { %407 = vmatprep.subr.bf16.mxu1 %v532_v0 }
  0x46   :  { %385 = vmatpush3.bf16.msra.mxu0 %v384_v21 }
  0x47   :  { %386 = vmatprep.subr.bf16.mxu0 %v532_v0 }
  0x48   :  { %409 = vmatpush3.bf16.msra.mxu1 %v408_v30 }
  0x49   :  { %410 = vmatprep.subr.bf16.mxu1 %v532_v0 }
  0x4a   :  { %388 = vmatpush3.bf16.msra.mxu0 %v387_v27 }
  0x4b   :  { %389 = vmatprep.subr.bf16.mxu0 %v532_v0 }
  0x4c   :  { %412 = vmatpush3.bf16.msra.mxu1 %v411_v36 }
  0x4d   :  { %413 = vmatprep.subr.bf16.mxu1 %v532_v0 }
  0x4e   :  { %391 = vmatpush3.bf16.msra.mxu0 %v390_v33 }
  0x4f   :  { %392 = vmatprep.subr.bf16.mxu0 %v532_v0 }
  0x50   :  { %415 = vmatpush3.bf16.msra.mxu1 %v414_v44 }
  0x51   :  { %416 = vmatprep.subr.bf16.mxu1 %v532_v0 }
  0x52   :  { %394 = vmatpush3.bf16.msra.mxu0 %v393_v37 }
  0x53   :  { %395 = vmatprep.subr.bf16.mxu0 %v532_v0 }
  0x54   :  { %418 = vmatpush3.bf16.msra.mxu1 %v417_v47 }
  0x55   :  { %419 = vmatprep.subr.bf16.mxu1 %v532_v0 }
  0x56   :  { %397 = vmatpush3.bf16.msra.mxu0 %v396_v40 }
  0x58   :  { %421 = vmatpush3.bf16.msra.mxu1 %v420_v50 }
  0x59   :  { %337 = vmatmul.mubr.f32.vlgmr.msra.gmra.mrb[0].mxu0 %v60_v41 }
 0x12c   :  { %v150_v52 = vpop.f32.mrb[0].mxu0 }
 0x12d   :  { %v151_v53 = vadd.f32 %v267_v51, %v150_v52  ;;  %v338_v54 = vpop.f32.mrb[1].mxu0 }
 0x12f   :  { %431 = vtanh.f32 %v151_v53 }
 0x139   :  { %v432_v55 = vpop.eup %431 }
 0x13a   :  { %372 = vmatmul.mubr.f32.vlgmr.msra.gmra.mrb[0].mxu1 %v432_v55 }
 0x20d   :  { %v244_v57 = vpop.f32.mrb[0].mxu1 }
 0x20e   :  { %v245_v58 = vadd.f32 %v268_v56, %v244_v57  ;;  %v373_v59 = vpop.f32.mrb[1].mxu1 }
 0x210   :  { %v269_v60 = vclamps-f32 %v245_v58, 0.3 }
 0x212   :  { %250 = vst [vmem:[#allocation8] sm:$0xff] %v269_v60 }
 0x213   :  { %510 = shalt.err (!%p507_p0)
}
 0x214   :  { %s511_s11 = scalar_lea.hbm %s647_s5, 128 }
 0x215   :  { %p512_p1 = scmp.ne.s32.totalorder %s647_s5, %s511_s11  ;;  %p515_p2 = scmp.lt.u32.totalorder %s511_s11, %s647_s5 }
 0x217   :  { %p517_p3 = pnand %p515_p2, %p512_p1 }
 0x219   :  { %520 = shalt.err (!%p517_p3)
}
 0x21a   :  { %260 = dma.vmem_to_hbm [thread:$0]  %s258_s8, 128, %s647_s5, [#allocation4]  }
 0x21b   :  { %525 = dma.done.wait [#allocation4], 128  }
 0x21c   :  { %526 = vsyncadd [#allocation4], 4294967168 }
 0x21d   :  { %264 = vsyncpa [#allocation3], 1 }
 0x21e   :  { %265 = vsyncpa [#allocation6], 1 }
 0x21f   :  { %266 = vsyncpa [#allocation4], 1 }

</bundles_post_ra>
